<compile_context>
chip_gen: v7x
topology: tpu7x:2x2x1
jax: 0.10.0
libtpu: 0.0.40
codegen_flags: <defaults>
</compile_context>

<pallas_src>
import math

import numpy as np
import jax
import jax.numpy as jnp
from jax.experimental import pallas as pl
from jax.experimental.pallas import tpu as pltpu


# ----------------------------------------------------------------------------
# pltpu.roll sign-convention probe (tiny one-off kernel, run once at build time)
# ----------------------------------------------------------------------------
def _probe_roll_flip():
    """True iff pltpu.roll(x, s)[i] == x[(i + s) % n] (opposite of np.roll)."""

    def kernel(x_ref, o_ref):
        o_ref[...] = pltpu.roll(x_ref[...], shift=1, axis=1)

    x = jnp.broadcast_to(jnp.arange(128, dtype=jnp.int32), (8, 128))
    out = pl.pallas_call(
        kernel, out_shape=jax.ShapeDtypeStruct((8, 128), jnp.int32))(x)
    val = int(out[0, 0])
    if val not in (1, 127):
        raise RuntimeError(f"unexpected pltpu.roll behaviour: {val}")
    return val == 1


def _shift_by(x, s, flip):
    """t[..., i] = x[..., (i + s) % n]; wrapped lanes are masked by the callers."""
    n = x.shape[-1]
    s = s % n
    if s == 0:
        return x
    amt = s if flip else (n - s)
    return pltpu.roll(x, shift=amt, axis=x.ndim - 1)


# ----------------------------------------------------------------------------
# numpy builders for the exact 0/1 constants fed to the kernel
# ----------------------------------------------------------------------------
def _conv_tap_masks(k, H, W):
    """(k*k, 1, H*W) 0/1 masks: row (dy+r)*k+(dx+r) marks output pixels whose
    shifted source (y+dy, x+dx) lies inside the image (implements zero padding)."""
    r = k // 2
    yy, xx = np.meshgrid(np.arange(H), np.arange(W), indexing='ij')
    yy = yy.reshape(-1)
    xx = xx.reshape(-1)
    rows = []
    for dy in range(-r, r + 1):
        for dx in range(-r, r + 1):
            valid = ((yy + dy >= 0) & (yy + dy < H) &
                     (xx + dx >= 0) & (xx + dx < W))
            rows.append(valid.astype(np.float32))
    return np.stack(rows, axis=0)[:, None, :]


def _conv_tap_shift_mats(k, H, W):
    """(k*k, HW, HW) one-hot matrices: x @ M[tap] == zero-padded spatial shift.
    Used for maps too small (HW < 128 lanes) for the lane-rotate path."""
    r = k // 2
    HW = H * W
    mats = np.zeros((k * k, HW, HW), np.float32)
    j = 0
    for dy in range(-r, r + 1):
        for dx in range(-r, r + 1):
            for y in range(H):
                for x in range(W):
                    ys, xs = y + dy, x + dx
                    if 0 <= ys < H and 0 <= xs < W:
                        mats[j, ys * W + xs, y * W + x] = 1.0
            j += 1
    return mats


def _pool_select_matrix(H, W):
    """(HW, Ho*Wo) one-hot: picks the top-left element of every 2x2 window."""
    Ho, Wo = H // 2, W // 2
    S = np.zeros((H * W, Ho * Wo), np.float32)
    for yo in range(Ho):
        for xo in range(Wo):
            S[(2 * yo) * W + 2 * xo, yo * Wo + xo] = 1.0
    return S


def _upsample_matrix(H, W):
    """(HW, 4*HW) one-hot: nearest-neighbour x2 expansion."""
    Ho, Wo = 2 * H, 2 * W
    U = np.zeros((H * W, Ho * Wo), np.float32)
    for y in range(Ho):
        for x in range(Wo):
            U[(y // 2) * W + (x // 2), y * Wo + x] = 1.0
    return U


def _yolo_grid(ny, nx, na, no):
    """(na*no, ny*nx): grid-x on rows a*no+0, grid-y on rows a*no+1, 0 elsewhere."""
    G = np.zeros((na * no, ny * nx), np.float32)
    xv = np.tile(np.arange(nx, dtype=np.float32), ny)
    yv = np.repeat(np.arange(ny, dtype=np.float32), nx)
    for a in range(na):
        G[a * no + 0] = xv
        G[a * no + 1] = yv
    return G


def _yolo_anchor(anchors, stride, no):
    """(na*no, 1): anchor_w/stride on rows a*no+2, anchor_h/stride on a*no+3."""
    na = anchors.shape[0]
    A = np.ones((na * no, 1), np.float32)
    av = np.asarray(anchors, np.float32) / float(stride)
    for a in range(na):
        A[a * no + 2, 0] = av[a, 0]
        A[a * no + 3, 0] = av[a, 1]
    return A


def _yolo_sel_masks(na, no):
    """Two (na*no, 1) 0/1 masks: xy rows and wh rows."""
    mxy = np.zeros((na * no, 1), np.float32)
    mwh = np.zeros((na * no, 1), np.float32)
    for a in range(na):
        mxy[a * no + 0, 0] = 1.0
        mxy[a * no + 1, 0] = 1.0
        mwh[a * no + 2, 0] = 1.0
        mwh[a * no + 3, 0] = 1.0
    return mxy, mwh


# ----------------------------------------------------------------------------
# cfg walk -> static op plan + packed constant arrays
# ----------------------------------------------------------------------------
def build_plan(module_defs, params, img_hw, in_ch=3):
    H0, W0 = img_hw
    c_in0 = ((in_ch + 7) // 8) * 8           # pad input channels to a sublane multiple
    consts = []

    def add_const(a):
        consts.append(jnp.asarray(a, jnp.float32))
        return len(consts) - 1

    tap_cache = {}
    ops, heads = [], []
    chans, sizes = [], []
    cur_c, cur_h, cur_w = c_in0, H0, W0
    strides_cfg = [16, 8]                     # hard-coded as in create_modules()
    yolo_index = -1
    for i, mdef in enumerate(module_defs[1:]):
        t = mdef['type']
        if t == 'convolutional':
            k = mdef['size']
            assert mdef.get('stride', 1) == 1, "only stride-1 convs in this cfg"
            assert k == 1 or mdef['pad'], "k>1 convs must use same-padding"
            cout = mdef['filters']
            pr = params[i]
            wraw = np.asarray(pr['w'], np.float32)             # (k*k, cin_raw, cout)
            cin_raw = wraw.shape[1]
            if cin_raw != cur_c:                               # zero-pad input channels
                wraw = np.pad(wraw, ((0, 0), (0, cur_c - cin_raw), (0, 0)))
            wt = wraw.reshape(k * k * cur_c, cout).T           # (cout, k*k*cin)
            op = dict(kind='conv', k=k, w=cur_w,
                      leaky=(mdef['activation'] == 'leaky'),
                      wi=add_const(wt),
                      si=add_const(np.asarray(pr['scale'], np.float32).reshape(cout, 1)),
                      bi=add_const(np.asarray(pr['shift'], np.float32).reshape(cout, 1)))
            if k > 1:
                hw = cur_h * cur_w
                key = (k, cur_h, cur_w)
                if key not in tap_cache:
                    if hw % 128 == 0:
                        tap_cache[key] = ('roll', add_const(_conv_tap_masks(k, cur_h, cur_w)))
                    else:
                        tap_cache[key] = ('shiftmat', add_const(_conv_tap_shift_mats(k, cur_h, cur_w)))
                kind_key, idx = tap_cache[key]
                op[kind_key] = idx
            ops.append(op)
            cur_c = cout
        elif t == 'maxpool':
            assert mdef['size'] == 2 and mdef['stride'] == 2
            assert (cur_h * cur_w) % 128 == 0  # TODO(synk): tiny maps would need the shift-matrix path
            ops.append(dict(kind='maxpool', w=cur_w,
                            pi=add_const(_pool_select_matrix(cur_h, cur_w))))
            cur_h, cur_w = cur_h // 2, cur_w // 2
        elif t == 'upsample':
            assert mdef['stride'] == 2
            ops.append(dict(kind='upsample',
                            ui=add_const(_upsample_matrix(cur_h, cur_w))))
            cur_h, cur_w = cur_h * 2, cur_w * 2
        elif t == 'shortcut':
            l = mdef['from'][0]
            ops.append(dict(kind='shortcut', src=(i + l if l < 0 else l)))
        elif t == 'route':
            srcs = [i + l if l < 0 else l for l in mdef['layers']]
            ops.append(dict(kind='route', srcs=srcs))
            cur_c = sum(chans[s] for s in srcs)
            cur_h, cur_w = sizes[srcs[0]]
        elif t == 'yolo':
            yolo_index += 1
            stride = strides_cfg[yolo_index]
            anchors = np.asarray(mdef['anchors'], np.float32)
            na, nc = anchors.shape[0], mdef['classes']
            no = nc + 5
            mxy, mwh = _yolo_sel_masks(na, no)
            op = dict(kind='yolo', na=na, no=no, ny=cur_h, nx=cur_w,
                      stride=float(stride),
                      gi=add_const(_yolo_grid(cur_h, cur_w, na, no)),
                      ai=add_const(_yolo_anchor(anchors, stride, no)),
                      xi=add_const(mxy),
                      hi=add_const(mwh))
            ops.append(op)
            heads.append(op)
        else:
            # TODO(synk): other darknet layer types are not exercised by this cfg.
            raise NotImplementedError(t)
        chans.append(cur_c)
        sizes.append((cur_h, cur_w))
    return ops, consts, c_in0, heads


# ----------------------------------------------------------------------------
# the single fused kernel (runs the whole cfg for one batch element)
# ----------------------------------------------------------------------------
def make_kernel(ops, n_consts, roll_flip):

    def kernel(*refs):
        cref = refs[1:1 + n_consts]
        orefs = refs[1 + n_consts:]
        x = refs[0][0]                           # (C0, H0*W0) channel-major activation
        outs = []
        head = 0
        for op in ops:
            kind = op['kind']
            if kind == 'conv':
                wt = cref[op['wi']][...]                          # (Cout, K*Cin)
                if op['k'] == 1:
                    y = jnp.dot(wt, x, preferred_element_type=jnp.float32)
                else:
                    taps = []
                    if 'roll' in op:
                        W = op['w']
                        r = op['k'] // 2
                        j = 0
                        for dy in range(-r, r + 1):
                            for dx in range(-r, r + 1):
                                t = _shift_by(x, dy * W + dx, roll_flip)
                                taps.append(t * cref[op['roll']][j])   # (1, HW) mask
                                j += 1
                    else:
                        mref = cref[op['shiftmat']]               # (K, HW, HW) one-hot
                        for j in range(op['k'] * op['k']):
                            taps.append(jnp.dot(x, mref[j],
                                                preferred_element_type=jnp.float32))
                    patches = jnp.concatenate(taps, axis=0)       # (K*Cin, HW)
                    y = jnp.dot(wt, patches, preferred_element_type=jnp.float32)
                y = y * cref[op['si']][...] + cref[op['bi']][...]
                if op['leaky']:
                    y = jnp.where(y > 0, y, 0.1 * y)
                x = y
            elif kind == 'maxpool':
                W = op['w']
                h = jnp.maximum(x, _shift_by(x, 1, roll_flip))
                v = jnp.maximum(h, _shift_by(h, W, roll_flip))
                x = jnp.dot(v, cref[op['pi']][...],
                            preferred_element_type=jnp.float32)
            elif kind == 'upsample':
                x = jnp.dot(x, cref[op['ui']][...],
                            preferred_element_type=jnp.float32)
            elif kind == 'shortcut':
                x = x + outs[op['src']]
            elif kind == 'route':
                feats = [outs[s] for s in op['srcs']]
                x = feats[0] if len(feats) == 1 else jnp.concatenate(feats, axis=0)
            elif kind == 'yolo':
                sig = jax.nn.sigmoid(x)
                G = cref[op['gi']][...]
                A = cref[op['ai']][...]
                mxy = cref[op['xi']][...]
                mwh = cref[op['hi']][...]
                xy = (sig * 2.0 - 0.5 + G) * op['stride']
                wh = jnp.square(sig * 2.0) * A * op['stride']
                io = mxy * xy + mwh * wh + (1.0 - mxy - mwh) * sig
                orefs[2 * head][0] = x                            # raw logits -> p
                orefs[2 * head + 1][0] = io                       # decoded detections
                head += 1
            outs.append(x)

    return kernel


def _const_spec(shape):
    zeros = (0,) * len(shape)
    return pl.BlockSpec(tuple(shape), lambda n, _z=zeros: _z)


def build_forward(module_defs, params, img_hw, in_ch=3):
    roll_flip = _probe_roll_flip()
    ops, consts, c_in0, heads = build_plan(module_defs, params, img_hw, in_ch)
    kernel = make_kernel(ops, len(consts), roll_flip)

    def forward(x_nchw, consts):
        N, C, H, W = x_nchw.shape
        x = x_nchw.astype(jnp.float32)
        if C != c_in0:
            x = jnp.pad(x, ((0, 0), (0, c_in0 - C), (0, 0), (0, 0)))
        x = x.reshape(N, c_in0, H * W)

        out_shapes, out_specs = [], []
        for op in heads:
            ch = op['na'] * op['no']
            nyx = op['ny'] * op['nx']
            for _ in range(2):                                    # (raw, io) per head
                out_shapes.append(jax.ShapeDtypeStruct((N, ch, nyx), jnp.float32))
                out_specs.append(pl.BlockSpec((1, ch, nyx), lambda n: (n, 0, 0)))
        in_specs = [pl.BlockSpec((1, c_in0, H * W), lambda n: (n, 0, 0))]
        in_specs += [_const_spec(c.shape) for c in consts]

        outs = pl.pallas_call(
            kernel,
            out_shape=tuple(out_shapes),
            grid=(N,),
            in_specs=in_specs,
            out_specs=tuple(out_specs),
            compiler_params=pltpu.CompilerParams(
                dimension_semantics=("parallel",)),
        )(x, *consts)

        dets, ps = [], []
        for hi, op in enumerate(heads):
            na, no, ny, nx = op['na'], op['no'], op['ny'], op['nx']
            raw = outs[2 * hi]
            io = outs[2 * hi + 1]
            p = raw.reshape(N, na, no, ny, nx).transpose(0, 1, 3, 4, 2)
            det = (io.reshape(N, na, no, ny, nx).transpose(0, 1, 3, 4, 2)
                   .reshape(N, na * ny * nx, no))
            ps.append(p)
            dets.append(det)
        return jnp.concatenate(dets, axis=1), tuple(ps)

    return jax.jit(forward), tuple(consts)


# ----------------------------------------------------------------------------
# Synthetic Darknet config (parsed module_defs list) and deterministic parameters
# ----------------------------------------------------------------------------
def make_cfg():
    return [
        {'type': 'net'},  # hyperparams (popped)
        {'type': 'convolutional', 'batch_normalize': 1, 'filters': 8,  'size': 3, 'stride': 1, 'pad': 1, 'activation': 'leaky'},
        {'type': 'maxpool', 'size': 2, 'stride': 2},
        {'type': 'convolutional', 'batch_normalize': 1, 'filters': 16, 'size': 3, 'stride': 1, 'pad': 1, 'activation': 'leaky'},
        {'type': 'maxpool', 'size': 2, 'stride': 2},
        {'type': 'convolutional', 'batch_normalize': 1, 'filters': 16, 'size': 3, 'stride': 1, 'pad': 1, 'activation': 'leaky'},
        {'type': 'shortcut', 'from': [-2], 'activation': 'linear'},
        {'type': 'convolutional', 'batch_normalize': 0, 'filters': 24, 'size': 1, 'stride': 1, 'pad': 1, 'activation': 'linear'},
        {'type': 'yolo', 'mask': [0, 1, 2], 'anchors': [(10, 14), (23, 27), (37, 58)], 'classes': 3},
        {'type': 'route', 'layers': [-4]},
        {'type': 'convolutional', 'batch_normalize': 1, 'filters': 8,  'size': 1, 'stride': 1, 'pad': 1, 'activation': 'leaky'},
        {'type': 'upsample', 'stride': 2},
        {'type': 'route', 'layers': [-1, 2]},
        {'type': 'convolutional', 'batch_normalize': 1, 'filters': 16, 'size': 3, 'stride': 1, 'pad': 1, 'activation': 'leaky'},
        {'type': 'convolutional', 'batch_normalize': 0, 'filters': 24, 'size': 1, 'stride': 1, 'pad': 1, 'activation': 'linear'},
        {'type': 'yolo', 'mask': [0, 1, 2], 'anchors': [(81, 82), (135, 169), (344, 319)], 'classes': 3},
    ]


def init_params(module_defs, key):
    params = {}
    out_filters = [3]  # like create_modules' output_filters (leading 3 input channels)
    for i, mdef in enumerate(module_defs[1:]):
        t = mdef['type']
        filters = out_filters[-1]
        if t == 'convolutional':
            k = mdef['size']
            cin = out_filters[-1]
            cout = mdef['filters']
            key, k1, k2, k3, k4, k5 = jax.random.split(key, 6)
            w = jax.random.normal(k1, (k * k, cin, cout), jnp.float32) / math.sqrt(k * k * cin)
            if mdef['batch_normalize']:
                gamma = 1.0 + 0.1 * jax.random.normal(k2, (cout,), jnp.float32)
                beta = 0.1 * jax.random.normal(k3, (cout,), jnp.float32)
                rmean = 0.1 * jax.random.normal(k4, (cout,), jnp.float32)
                rvar = 1.0 + 0.1 * jax.random.uniform(k5, (cout,), jnp.float32)
                scale = gamma / jnp.sqrt(rvar + 1e-4)      # eps = 0.0001 (as in BatchNorm2d)
                shift = beta - rmean * scale
            else:
                bias = 0.1 * jax.random.normal(k2, (cout,), jnp.float32)
                scale = jnp.ones((cout,), jnp.float32)
                shift = bias
            params[i] = {'w': w, 'scale': scale[None], 'shift': shift[None]}
            filters = cout
        elif t == 'route':
            filters = sum(out_filters[l + 1 if l > 0 else l] for l in mdef['layers'])
        elif t == 'shortcut':
            filters = out_filters[-1]
        out_filters.append(filters)
    return params


# ----------------------------------------------------------------------------
# Pure-JAX reference (for correctness check only)
# ----------------------------------------------------------------------------
def darknet_forward_ref(x_nchw, params, module_defs):
    x = jnp.transpose(x_nchw, (0, 2, 3, 1)).astype(jnp.float32)
    out, yolo_out = [], []
    yolo_index = -1
    strides = [16, 8]
    for i, mdef in enumerate(module_defs[1:]):
        t = mdef['type']
        if t == 'convolutional':
            pr = params[i]
            k = mdef['size']
            pad = k // 2 if mdef['pad'] else 0
            wr = pr['w'].reshape(k, k, pr['w'].shape[1], pr['w'].shape[2])
            y = jax.lax.conv_general_dilated(
                x, wr, (1, 1), [(pad, pad), (pad, pad)],
                dimension_numbers=('NHWC', 'HWIO', 'NHWC'),
                precision=jax.lax.Precision.HIGHEST)
            y = y * pr['scale'][0] + pr['shift'][0]
            if mdef['activation'] == 'leaky':
                y = jnp.where(y > 0, y, 0.1 * y)
            x = y
        elif t == 'maxpool':
            N, H, W, C = x.shape
            x = jnp.max(x.reshape(N, H // 2, 2, W // 2, 2, C), axis=(2, 4))
        elif t == 'upsample':
            x = jnp.repeat(jnp.repeat(x, 2, axis=1), 2, axis=2)
        elif t == 'shortcut':
            l = mdef['from'][0]
            x = x + (out[i + l] if l < 0 else out[l])
        elif t == 'route':
            feats = [out[i + l] if l < 0 else out[l] for l in mdef['layers']]
            x = feats[0] if len(feats) == 1 else jnp.concatenate(feats, axis=-1)
        elif t == 'yolo':
            yolo_index += 1
            stride = strides[yolo_index]
            anchors = jnp.asarray(mdef['anchors'], jnp.float32)
            na, nc = anchors.shape[0], mdef['classes']
            no = nc + 5
            N, ny, nx, _ = x.shape
            p = x.reshape(N, ny, nx, na, no).transpose(0, 3, 1, 2, 4)
            io = jax.nn.sigmoid(p)
            yv, xv = jnp.meshgrid(jnp.arange(ny, dtype=jnp.float32),
                                  jnp.arange(nx, dtype=jnp.float32), indexing='ij')
            grid = jnp.stack([xv, yv], -1)[None, None]
            anchor_wh = (anchors / stride).reshape(1, na, 1, 1, 2)
            xy = (io[..., :2] * 2.0 - 0.5 + grid) * stride
            wh = (io[..., 2:4] * 2.0) ** 2 * anchor_wh * stride
            io = jnp.concatenate([xy, wh, io[..., 4:]], axis=-1)
            yolo_out.append((io.reshape(N, -1, no), p))
        out.append(x)
    io, p = zip(*yolo_out)
    return [], jnp.concatenate(io, axis=1), p


if __name__ == "__main__":
    key = jax.random.PRNGKey(0)
    kx, kp = jax.random.split(key)
    cfg = make_cfg()
    params = init_params(cfg, kp)
    x = jax.random.normal(kx, (2, 3, 32, 32), jnp.float32)   # NCHW input

    forward, consts = build_forward(cfg, params, (32, 32), in_ch=3)
    det, p = forward(x, consts)
    det = jax.block_until_ready(det)
    p = tuple(jax.block_until_ready(pi) for pi in p)
    spp = []   # this cfg has no 'spp' convs -> Darknet.forward_once returns an empty list

    # sanity: shapes
    assert det.shape == (2, 3 * 8 * 8 + 3 * 16 * 16, 8), det.shape
    assert p[0].shape == (2, 3, 8, 8, 8) and p[1].shape == (2, 3, 16, 16, 8)

    # correctness vs pure-JAX reference (all-f32 pipeline -> tight tolerance)
    _, det_r, p_r = darknet_forward_ref(x, params, cfg)
    assert jnp.allclose(det, det_r, rtol=1e-3, atol=1e-3), float(jnp.max(jnp.abs(det - det_r)))
    for a, b in zip(p, p_r):
        assert jnp.allclose(a, b, rtol=1e-3, atol=1e-3)

    print("KERNEL_OK")
</pallas_src>

<mosaic_0001>
module attributes {stable_mosaic.version = 11 : i64} {
  func.func @kernel(%arg0: memref<8x128xi32, #tpu.memory_space<vmem>>, %arg1: memref<8x128xi32, #tpu.memory_space<vmem>>) attributes {dimension_semantics = [], scalar_prefetch = 0 : i64, scratch_operands = 0 : i64, tpu.core_type = #tpu.core_type<tc>} {
    %c0 = arith.constant 0 : index
    %c0_0 = arith.constant 0 : index
    %0 = vector.load %arg0[%c0, %c0_0] : memref<8x128xi32, #tpu.memory_space<vmem>>, vector<8x128xi32>
    %c1_i32 = arith.constant 1 : i32
    %1 = tpu.dynamic_rotate %0 by %c1_i32 dim 1 : vector<8x128xi32>, i32 -> vector<8x128xi32>
    %c0_1 = arith.constant 0 : index
    %c0_2 = arith.constant 0 : index
    %2 = vector.load %arg1[%c0_1, %c0_2] : memref<8x128xi32, #tpu.memory_space<vmem>>, vector<8x128xi32>
    tpu.vector_store %arg1[%c0_1, %c0_2], %1 {strides = array<i32>} : memref<8x128xi32, #tpu.memory_space<vmem>>, vector<8x128xi32>,
    return
  }
}

</mosaic_0001>

<bundles_post_ra>
// kernel: tpu_custom_call.1
= control target key start
LH: loop header
LB: loop body
LE: loop exit
PB: predicated region body
PF: predicated region fallthrough
CT: control target
= control target key end

     0   :  { %6 = vsyncpa [#allocation3], 0  ;;  %s128_s0 = inlined_call_operand.hbm [shape: s32[8,128], index: 0, kind: input, shape index: {}]   ;;  %s129_s1 = inlined_call_operand.hbm [shape: s32[8,128], index: 1, kind: output, shape index: {}]  }
   0x1   :  { %7 = vsyncpa [#allocation4], 0  ;;  %s91_s6 = smov [#allocation2]   ;;  %s43_s10 = scalar_lea.hbm %s128_s0, 128 }
   0x2   :  { %s14_s7 = sshll.u32 %s91_s6, 4  ;;  %p44_p0 = scmp.ne.s32.totalorder %s128_s0, %s43_s10  ;;  %s15_s7 = int_to_ptr.vmem [resolvable:$true] %s14_s7 }
   0x3   :  { %p47_p1 = scmp.lt.u32.totalorder %s43_s10, %s128_s0 }
   0x5   :  { %p49_p2 = pnand %p47_p1, %p44_p0 }
   0x7   :  { %52 = shalt.err (!%p49_p2)
}
   0x8   :  { %s53_s15 = scalar_lea.vmem %s15_s7, 128  ;;  %p58_p4 = scmp.lt.s32.totalorder %s15_s7, %s15_s7 }
   0x9   :  { %p54_p3 = scmp.ne.s32.totalorder %s15_s7, %s53_s15  ;;  %p59_p5 = scmp.lt.s32.totalorder %s53_s15, %s53_s15 }
   0xb   :  { %p60_p6 = por %p59_p5, %p58_p4 }
   0xd   :  { %p61_p7 = pnand %p60_p6, %p54_p3 }
   0xf   :  { %64 = shalt.err (!%p61_p7)
}
  0x10   :  { %17 = dma.hbm_to_vmem [thread:$0]  %s128_s0, 128, %s15_s7, [#allocation3]  }
  0x11   :  { %87 = dma.done.wait [#allocation3], 128  }
  0x12   :  { %88 = vsyncadd [#allocation3], 4294967168  ;;  %v21_v0 = vld [vmem:[#allocation2] sm:$0xff]  ;;  %s92_s18 = smov 1   ;;  %s93_s19 = smov [#allocation5]  }
  0x13   :  { %22 = vrot.lane.b32.xlu0 %v21_v0, %s92_s18  ;;  %s31_s20 = sshll.u32 %s93_s19, 4  ;;  %s32_s20 = int_to_ptr.vmem [resolvable:$true] %s31_s20 }
  0x14   :  { %s65_s21 = scalar_lea.vmem %s32_s20, 128  ;;  %p70_p9 = scmp.lt.s32.totalorder %s32_s20, %s32_s20 }
  0x15   :  { %p66_p8 = scmp.ne.s32.totalorder %s32_s20, %s65_s21  ;;  %p71_p10 = scmp.lt.s32.totalorder %s65_s21, %s65_s21 }
  0x17   :  { %p72_p11 = por %p71_p10, %p70_p9 }
  0x19   :  { %p73_p12 = pnand %p72_p11, %p66_p8 }
  0x85   :  { %v23_v1 = vpop.permute.xlu0 %22 }
  0x86   :  { %24 = vst [vmem:[#allocation5] sm:$0xff] %v23_v1 }
  0x87   :  { %76 = shalt.err (!%p73_p12)
}
  0x88   :  { %s77_s0 = scalar_lea.hbm %s129_s1, 128 }
  0x89   :  { %p78_p13 = scmp.ne.s32.totalorder %s129_s1, %s77_s0  ;;  %p81_p0 = scmp.lt.u32.totalorder %s77_s0, %s129_s1 }
  0x8b   :  { %p83_p1 = pnand %p81_p0, %p78_p13 }
  0x8d   :  { %86 = shalt.err (!%p83_p1)
}
  0x8e   :  { %34 = dma.vmem_to_hbm [thread:$0]  %s32_s20, 128, %s129_s1, [#allocation4]  }
  0x8f   :  { %89 = dma.done.wait [#allocation4], 128  }
  0x90   :  { %90 = vsyncadd [#allocation4], 4294967168 }
  0x91   :  { %38 = vsyncpa [#allocation3], 1 }
  0x92   :  { %39 = vsyncpa [#allocation4], 1 }

</bundles_post_ra>
